<compile_context>
chip_gen: v7x
topology: tpu7x:2x2x1
jax: 0.10.0
libtpu: 0.0.40
codegen_flags: <defaults>
</compile_context>

<pallas_src>
import functools
import math

import jax
import jax.numpy as jnp
from jax.experimental import pallas as pl
from jax.experimental.pallas import tpu as pltpu


def _layer_norm_f32(x_f32, gamma, beta, eps=1e-5):
    # x_f32: (T, H) float32; gamma/beta: (1, H). PyTorch LayerNorm (biased variance).
    mean = jnp.mean(x_f32, axis=-1, keepdims=True)
    var = jnp.mean((x_f32 - mean) ** 2, axis=-1, keepdims=True)
    inv = jax.lax.rsqrt(var + eps)
    return (x_f32 - mean) * inv * gamma.astype(jnp.float32) + beta.astype(jnp.float32)


def transformer_head_kernel(
    x_ref,                                   # (1, S, H): full sequence for batch b
    wq_ref, bq_ref, wk_ref, bk_ref, wv_ref, bv_ref,
    g1_ref, be1_ref,
    w1_ref, b1_ref, w2_ref, b2_ref,
    g2_ref, be2_ref,
    o_ref,                                   # (1, tq, H)
    k_scr, v_scr,                            # (S, H) compute dtype; persist across seq tiles
    attn_scr,                                # (tq, H) float32
    *, num_heads, head_size, tq, approx_recip,
):
    s_idx = pl.program_id(1)
    x2d = x_ref.at[0]                        # (S, H) ref view, no load
    cdtype = x_ref.dtype
    scale = 1.0 / math.sqrt(head_size)

    # K/V projections once per batch element (first query tile); reused by every
    # subsequent query tile of the same batch element.
    @pl.when(s_idx == 0)
    def _():
        xf = x2d[...]                        # (S, H)
        k = jnp.dot(xf, wk_ref[...], preferred_element_type=jnp.float32) + bk_ref[...]
        v = jnp.dot(xf, wv_ref[...], preferred_element_type=jnp.float32) + bv_ref[...]
        k_scr[...] = k.astype(cdtype)
        v_scr[...] = v.astype(cdtype)

    # Query / residual rows for this tile, sliced from the resident block (no extra
    # HBM input, no extra double-buffered VMEM buffer).
    q_start = pl.multiple_of(s_idx * tq, tq)
    xq = x2d[pl.ds(q_start, tq), :]          # (tq, H) original input rows
    q = jnp.dot(xq, wq_ref[...], preferred_element_type=jnp.float32) + bq_ref[...]
    q = (q * scale).astype(cdtype)

    k = k_scr[...]
    v = v_scr[...]

    # Per-head attention; num_heads is a small Python int -> bounded static unroll.
    qkt_dims = (((1,), (1,)), ((), ()))      # contract on head_size axis: q @ k^T
    for h in range(num_heads):
        lo = h * head_size
        qh = q[:, lo:lo + head_size]         # (tq, hs)
        kh = k[:, lo:lo + head_size]         # (S,  hs)
        vh = v[:, lo:lo + head_size]         # (S,  hs)
        s = jax.lax.dot_general(qh, kh, qkt_dims,
                                preferred_element_type=jnp.float32)   # (tq, S)
        s = s - jnp.max(s, axis=-1, keepdims=True)
        p = jnp.exp(s)
        denom = jnp.sum(p, axis=-1, keepdims=True)
        if approx_recip:
            p = p * pl.reciprocal(denom, approx=True)                 # EUP slot
        else:
            p = p / denom
        attn_scr[:, lo:lo + head_size] = jnp.dot(
            p.astype(cdtype), vh, preferred_element_type=jnp.float32)

    xq_f32 = xq.astype(jnp.float32)

    # x1 = LayerNorm1(x + dropout(attn(x)))   (dropout = identity, eval mode)
    x1 = _layer_norm_f32(xq_f32 + attn_scr[...], g1_ref[...], be1_ref[...])

    # Feedforward: Linear(H, FF) -> ReLU -> Linear(FF, H); weights pre-transposed (in, out).
    ff = jnp.dot(x1.astype(cdtype), w1_ref[...], preferred_element_type=jnp.float32)
    ff = jnp.maximum(ff + b1_ref[...], 0.0).astype(cdtype)
    ff = jnp.dot(ff, w2_ref[...], preferred_element_type=jnp.float32) + b2_ref[...]

    # x2 = LayerNorm2(x1 + dropout(ff))
    x2 = _layer_norm_f32(x1 + ff, g2_ref[...], be2_ref[...])

    # Final residual with the ORIGINAL input rows.
    o_ref[0] = (x2 + xq_f32).astype(o_ref.dtype)


def prepare_weights(params, compute_dtype=None):
    """One-time prep: transpose linear weights to (in, out); optionally cast the
    matmul weights to a lower-precision compute dtype (bf16 recommended at scale).
    Biases and LayerNorm params stay in their original (f32) dtype."""
    def cast_w(w):
        wt = w.T
        return wt.astype(compute_dtype) if compute_dtype is not None else wt
    return (
        cast_w(params["wq"]), params["bq"],
        cast_w(params["wk"]), params["bk"],
        cast_w(params["wv"]), params["bv"],
        params["gamma1"], params["beta1"],
        cast_w(params["w1"]), params["b1"],
        cast_w(params["w2"]), params["b2"],
        params["gamma2"], params["beta2"],
    )


def _default_vmem_limit_bytes():
    # Generation-aware scoped-VMEM limit with headroom. This is a sizing hint only
    # (does not affect semantics), so a broad fallback here is safe.
    cap = None
    try:
        cap = pltpu.get_tpu_info().vmem_capacity_bytes
    except Exception:
        cap = None
    if not cap:
        cap = 64 * 1024 * 1024          # conservative (v7x per-TC VMEM)
    return min(int(cap) * 3 // 4, 112 * 1024 * 1024)


def transformer_head(x, prepared_weights, *, num_heads, approx_softmax_recip=True):
    (wq_t, bq, wk_t, bk, wv_t, bv,
     g1, be1, w1_t, b1, w2_t, b2, g2, be2) = prepared_weights

    B, S, H = x.shape
    assert H % num_heads == 0
    head_size = H // num_heads
    FF = w1_t.shape[1]

    cdtype = wq_t.dtype                      # matmul / MXU operand dtype
    x_c = x.astype(cdtype)

    # Query-tile size: 256 fills the 256-wide MXU M dim on v6e/v7x and halves the
    # number of grid steps; 128 fallback; full S for short sequences.
    if S % 256 == 0:
        tq = 256
    elif S % 128 == 0:
        tq = 128
    else:
        tq = S
    n_seq_tiles = S // tq

    kernel = functools.partial(
        transformer_head_kernel,
        num_heads=num_heads, head_size=head_size, tq=tq,
        approx_recip=approx_softmax_recip)

    weights = (wq_t, bq, wk_t, bk, wv_t, bv, g1, be1, w1_t, b1, w2_t, b2, g2, be2)

    itemsize = jnp.dtype(x.dtype).itemsize
    weight_bytes = sum(int(w.size) * jnp.dtype(w.dtype).itemsize for w in weights)
    cost = pl.CostEstimate(
        # K/V projections are computed once per batch element (not per query tile).
        flops=B * (2 * S * H * (3 * H + 2 * FF) + 4 * S * S * H),
        transcendentals=B * num_heads * S * S,
        bytes_accessed=2 * B * S * H * itemsize + weight_bytes,
    )

    def wspec(shape):
        nd = len(shape)
        return pl.BlockSpec(shape, lambda b, s, _nd=nd: (0,) * _nd)   # grid-invariant

    in_specs = [
        # Full sequence for batch b. The block index is constant across the seq axis,
        # so Pallas re-DMAs it only when b changes (once per batch element).
        pl.BlockSpec((1, S, H), lambda b, s: (b, 0, 0)),
        wspec((H, H)), wspec((1, H)),        # wq^T, bq
        wspec((H, H)), wspec((1, H)),        # wk^T, bk
        wspec((H, H)), wspec((1, H)),        # wv^T, bv
        wspec((1, H)), wspec((1, H)),        # gamma1, beta1
        wspec((H, FF)), wspec((1, FF)),      # w1^T, b1
        wspec((FF, H)), wspec((1, H)),       # w2^T, b2
        wspec((1, H)), wspec((1, H)),        # gamma2, beta2
    ]

    return pl.pallas_call(
        kernel,
        out_shape=jax.ShapeDtypeStruct((B, S, H), x.dtype),
        grid_spec=pltpu.PrefetchScalarGridSpec(
            num_scalar_prefetch=0,
            grid=(B, n_seq_tiles),
            in_specs=in_specs,
            out_specs=pl.BlockSpec((1, tq, H), lambda b, s: (b, s, 0)),
            scratch_shapes=[
                pltpu.VMEM((S, H), cdtype),        # K (once per batch element)
                pltpu.VMEM((S, H), cdtype),        # V (once per batch element)
                pltpu.VMEM((tq, H), jnp.float32),  # per-tile attention context
            ],
        ),
        compiler_params=pltpu.CompilerParams(
            # Batch is megacore-parallel; the seq-tile axis must be "arbitrary"
            # because the K/V scratch is carried across it.
            dimension_semantics=("parallel", "arbitrary"),
            vmem_limit_bytes=_default_vmem_limit_bytes(),
        ),
        cost_estimate=cost,
    )(x_c, *weights)


def init_params(key, hidden_size, ff_hidden_size):
    ks = jax.random.split(key, 8)
    scale = 0.05
    return {
        "wq": scale * jax.random.normal(ks[0], (hidden_size, hidden_size), jnp.float32),
        "bq": scale * jax.random.normal(ks[1], (1, hidden_size), jnp.float32),
        "wk": scale * jax.random.normal(ks[2], (hidden_size, hidden_size), jnp.float32),
        "bk": scale * jax.random.normal(ks[3], (1, hidden_size), jnp.float32),
        "wv": scale * jax.random.normal(ks[4], (hidden_size, hidden_size), jnp.float32),
        "bv": scale * jax.random.normal(ks[5], (1, hidden_size), jnp.float32),
        "gamma1": jnp.ones((1, hidden_size), jnp.float32),
        "beta1": jnp.zeros((1, hidden_size), jnp.float32),
        "w1": scale * jax.random.normal(ks[6], (ff_hidden_size, hidden_size), jnp.float32),
        "b1": jnp.zeros((1, ff_hidden_size), jnp.float32),
        "w2": scale * jax.random.normal(ks[7], (hidden_size, ff_hidden_size), jnp.float32),
        "b2": jnp.zeros((1, hidden_size), jnp.float32),
        "gamma2": jnp.ones((1, hidden_size), jnp.float32),
        "beta2": jnp.zeros((1, hidden_size), jnp.float32),
    }


def transformer_head_ref(x, params, *, num_heads):
    # Pure-JAX reference implementing the PyTorch forward (dropout = identity).
    B, S, H = x.shape
    hs = H // num_heads

    def lin(v, w, b):
        return jnp.einsum("bsh,oh->bso", v, w) + b[0]

    q = lin(x, params["wq"], params["bq"]).reshape(B, S, num_heads, hs).transpose(0, 2, 1, 3)
    k = lin(x, params["wk"], params["bk"]).reshape(B, S, num_heads, hs).transpose(0, 2, 1, 3)
    v = lin(x, params["wv"], params["bv"]).reshape(B, S, num_heads, hs).transpose(0, 2, 1, 3)
    scores = jnp.einsum("bhqd,bhkd->bhqk", q, k) / math.sqrt(hs)
    p = jax.nn.softmax(scores, axis=-1)
    attn = jnp.einsum("bhqk,bhkd->bhqd", p, v).transpose(0, 2, 1, 3).reshape(B, S, H)

    def ln(v, g, b):
        m = jnp.mean(v, axis=-1, keepdims=True)
        var = jnp.mean((v - m) ** 2, axis=-1, keepdims=True)
        return (v - m) / jnp.sqrt(var + 1e-5) * g[0] + b[0]

    x1 = ln(x + attn, params["gamma1"], params["beta1"])
    ff = jnp.maximum(lin(x1, params["w1"], params["b1"]), 0.0)
    ff = lin(ff, params["w2"], params["b2"])
    x2 = ln(x1 + ff, params["gamma2"], params["beta2"])
    return x2 + x


if __name__ == "__main__":
    B, S, H = 2, 8, 32
    NUM_HEADS = 4
    FF = 64

    key = jax.random.PRNGKey(0)
    kx, kp = jax.random.split(key)
    x = jax.random.normal(kx, (B, S, H), jnp.float32)
    params = init_params(kp, H, FF)

    # Transpose (and optionally down-cast) weights ONCE, outside the call path.
    prepared = prepare_weights(params)            # f32 compute for the small demo

    out = transformer_head(x, prepared, num_heads=NUM_HEADS)
    out = jax.block_until_ready(out)

    ref = transformer_head_ref(x, params, num_heads=NUM_HEADS)
    assert out.shape == (B, S, H)
    # Approx-reciprocal softmax (EUP) + reordered accumulation -> slightly loose tol.
    err = float(jnp.max(jnp.abs(out - ref)))
    assert jnp.allclose(out, ref, atol=2e-3, rtol=2e-3), err

    print("KERNEL_OK")
</pallas_src>

<mosaic_0001>
module attributes {stable_mosaic.version = 11 : i64} {
  func.func @transformer_head_kernel(%arg0: i32, %arg1: i32, %arg2: memref<1x8x32xf32, #tpu.memory_space<vmem>>, %arg3: memref<32x32xf32, #tpu.memory_space<vmem>>, %arg4: memref<1x32xf32, #tpu.memory_space<vmem>>, %arg5: memref<32x32xf32, #tpu.memory_space<vmem>>, %arg6: memref<1x32xf32, #tpu.memory_space<vmem>>, %arg7: memref<32x32xf32, #tpu.memory_space<vmem>>, %arg8: memref<1x32xf32, #tpu.memory_space<vmem>>, %arg9: memref<1x32xf32, #tpu.memory_space<vmem>>, %arg10: memref<1x32xf32, #tpu.memory_space<vmem>>, %arg11: memref<32x64xf32, #tpu.memory_space<vmem>>, %arg12: memref<1x64xf32, #tpu.memory_space<vmem>>, %arg13: memref<64x32xf32, #tpu.memory_space<vmem>>, %arg14: memref<1x32xf32, #tpu.memory_space<vmem>>, %arg15: memref<1x32xf32, #tpu.memory_space<vmem>>, %arg16: memref<1x32xf32, #tpu.memory_space<vmem>>, %arg17: memref<1x8x32xf32, #tpu.memory_space<vmem>>, %arg18: memref<8x32xf32, #tpu.memory_space<vmem>>, %arg19: memref<8x32xf32, #tpu.memory_space<vmem>>, %arg20: memref<8x32xf32, #tpu.memory_space<vmem>>) attributes {dimension_semantics = [#tpu.dimension_semantics<parallel>, #tpu.dimension_semantics<arbitrary>], iteration_bounds = array<i64: 2, 1>, scalar_prefetch = 0 : i64, scratch_operands = 3 : i64, tpu.core_type = #tpu.core_type<tc>, window_params = [{transform_indices = @transform_0, window_bounds = array<i64: 1, 8, 32>}, {pipeline_mode = #tpu.pipeline_mode<synchronous>, transform_indices = @transform_1, window_bounds = array<i64: 32, 32>}, {pipeline_mode = #tpu.pipeline_mode<synchronous>, transform_indices = @transform_2, window_bounds = array<i64: 1, 32>}, {pipeline_mode = #tpu.pipeline_mode<synchronous>, transform_indices = @transform_3, window_bounds = array<i64: 32, 32>}, {pipeline_mode = #tpu.pipeline_mode<synchronous>, transform_indices = @transform_4, window_bounds = array<i64: 1, 32>}, {pipeline_mode = #tpu.pipeline_mode<synchronous>, transform_indices = @transform_5, window_bounds = array<i64: 32, 32>}, {pipeline_mode = #tpu.pipeline_mode<synchronous>, transform_indices = @transform_6, window_bounds = array<i64: 1, 32>}, {pipeline_mode = #tpu.pipeline_mode<synchronous>, transform_indices = @transform_7, window_bounds = array<i64: 1, 32>}, {pipeline_mode = #tpu.pipeline_mode<synchronous>, transform_indices = @transform_8, window_bounds = array<i64: 1, 32>}, {pipeline_mode = #tpu.pipeline_mode<synchronous>, transform_indices = @transform_9, window_bounds = array<i64: 32, 64>}, {pipeline_mode = #tpu.pipeline_mode<synchronous>, transform_indices = @transform_10, window_bounds = array<i64: 1, 64>}, {pipeline_mode = #tpu.pipeline_mode<synchronous>, transform_indices = @transform_11, window_bounds = array<i64: 64, 32>}, {pipeline_mode = #tpu.pipeline_mode<synchronous>, transform_indices = @transform_12, window_bounds = array<i64: 1, 32>}, {pipeline_mode = #tpu.pipeline_mode<synchronous>, transform_indices = @transform_13, window_bounds = array<i64: 1, 32>}, {pipeline_mode = #tpu.pipeline_mode<synchronous>, transform_indices = @transform_14, window_bounds = array<i64: 1, 32>}, {transform_indices = @transform_15, window_bounds = array<i64: 1, 8, 32>}]} {
    %c0_i32 = arith.constant 0 : i32
    %0 = arith.cmpi eq, %arg1, %c0_i32 : i32
    %1 = arith.extui %0 : i1 to i32
    %c0_i32_0 = arith.constant 0 : i32
    %c0_i32_1 = arith.constant 0 : i32
    %2 = arith.cmpi ne, %1, %c0_i32_1 : i32
    scf.if %2 {
      %149 = arith.index_cast %c0_i32_0 : i32 to index
      %c0_69 = arith.constant 0 : index
      %c0_70 = arith.constant 0 : index
      %150 = vector.load %arg2[%149, %c0_69, %c0_70] : memref<1x8x32xf32, #tpu.memory_space<vmem>>, vector<1x8x32xf32>
      %151 = vector.shape_cast %150 : vector<1x8x32xf32> to vector<8x32xf32>
      %c0_71 = arith.constant 0 : index
      %c0_72 = arith.constant 0 : index
      %152 = vector.load %arg5[%c0_71, %c0_72] : memref<32x32xf32, #tpu.memory_space<vmem>>, vector<32x32xf32>
      %cst_73 = arith.constant dense<0.000000e+00> : vector<8x32xf32>
      %153 = tpu.matmul %151, %152, %cst_73 {dimension_numbers = #tpu.dot_dimension_numbers<[1], [0], [0], [1], [0, 0, 1, 1], [], []>} : vector<8x32xf32>, vector<32x32xf32>, vector<8x32xf32> -> vector<8x32xf32>
      %c0_74 = arith.constant 0 : index
      %c0_75 = arith.constant 0 : index
      %154 = vector.load %arg6[%c0_74, %c0_75] : memref<1x32xf32, #tpu.memory_space<vmem>>, vector<1x32xf32>
      %155 = vector.broadcast %154 : vector<1x32xf32> to vector<8x32xf32>
      %156 = arith.addf %153, %155 : vector<8x32xf32>
      %c0_76 = arith.constant 0 : index
      %c0_77 = arith.constant 0 : index
      %157 = vector.load %arg7[%c0_76, %c0_77] : memref<32x32xf32, #tpu.memory_space<vmem>>, vector<32x32xf32>
      %cst_78 = arith.constant dense<0.000000e+00> : vector<8x32xf32>
      %158 = tpu.matmul %151, %157, %cst_78 {dimension_numbers = #tpu.dot_dimension_numbers<[1], [0], [0], [1], [0, 0, 1, 1], [], []>} : vector<8x32xf32>, vector<32x32xf32>, vector<8x32xf32> -> vector<8x32xf32>
      %c0_79 = arith.constant 0 : index
      %c0_80 = arith.constant 0 : index
      %159 = vector.load %arg8[%c0_79, %c0_80] : memref<1x32xf32, #tpu.memory_space<vmem>>, vector<1x32xf32>
      %160 = vector.broadcast %159 : vector<1x32xf32> to vector<8x32xf32>
      %161 = arith.addf %158, %160 : vector<8x32xf32>
      %c0_81 = arith.constant 0 : index
      %c0_82 = arith.constant 0 : index
      %162 = vector.load %arg18[%c0_81, %c0_82] : memref<8x32xf32, #tpu.memory_space<vmem>>, vector<8x32xf32>
      tpu.vector_store %arg18[%c0_81, %c0_82], %156 {strides = array<i32>} : memref<8x32xf32, #tpu.memory_space<vmem>>, vector<8x32xf32>,
      %c0_83 = arith.constant 0 : index
      %c0_84 = arith.constant 0 : index
      %163 = vector.load %arg19[%c0_83, %c0_84] : memref<8x32xf32, #tpu.memory_space<vmem>>, vector<8x32xf32>
      tpu.vector_store %arg19[%c0_83, %c0_84], %161 {strides = array<i32>} : memref<8x32xf32, #tpu.memory_space<vmem>>, vector<8x32xf32>,
    } else {
    }
    %c8_i32 = arith.constant 8 : i32
    %3 = arith.muli %arg1, %c8_i32 : i32
    %4 = tpu.assume_multiple %3, 8 : i32
    %c0_i32_2 = arith.constant 0 : i32
    %c0_i32_3 = arith.constant 0 : i32
    %c0_i32_4 = arith.constant 0 : i32
    %5 = tpu.memref_slice %arg2[%c0_i32_2, %c0_i32_3, %c0_i32_4] : memref<1x8x32xf32, #tpu.memory_space<vmem>> -> memref<1x8x32xf32, #tpu.memory_space<vmem>>
    %6 = tpu.memref_squeeze %5 : memref<1x8x32xf32, #tpu.memory_space<vmem>> -> memref<8x32xf32, #tpu.memory_space<vmem>>
    %7 = arith.index_cast %4 : i32 to index
    %c0 = arith.constant 0 : index
    %8 = vector.load %6[%7, %c0] : memref<8x32xf32, #tpu.memory_space<vmem>>, vector<8x32xf32>
    %c0_5 = arith.constant 0 : index
    %c0_6 = arith.constant 0 : index
    %9 = vector.load %arg3[%c0_5, %c0_6] : memref<32x32xf32, #tpu.memory_space<vmem>>, vector<32x32xf32>
    %cst = arith.constant dense<0.000000e+00> : vector<8x32xf32>
    %10 = tpu.matmul %8, %9, %cst {dimension_numbers = #tpu.dot_dimension_numbers<[1], [0], [0], [1], [0, 0, 1, 1], [], []>} : vector<8x32xf32>, vector<32x32xf32>, vector<8x32xf32> -> vector<8x32xf32>
    %c0_7 = arith.constant 0 : index
    %c0_8 = arith.constant 0 : index
    %11 = vector.load %arg4[%c0_7, %c0_8] : memref<1x32xf32, #tpu.memory_space<vmem>>, vector<1x32xf32>
    %12 = vector.broadcast %11 : vector<1x32xf32> to vector<8x32xf32>
    %13 = arith.addf %10, %12 : vector<8x32xf32>
    %cst_9 = arith.constant 0.353553385 : f32
    %14 = vector.broadcast %cst_9 : f32 to vector<8x32xf32>
    %15 = arith.mulf %13, %14 : vector<8x32xf32>
    %c0_10 = arith.constant 0 : index
    %c0_11 = arith.constant 0 : index
    %16 = vector.load %arg18[%c0_10, %c0_11] : memref<8x32xf32, #tpu.memory_space<vmem>>, vector<8x32xf32>
    %c0_12 = arith.constant 0 : index
    %c0_13 = arith.constant 0 : index
    %17 = vector.load %arg19[%c0_12, %c0_13] : memref<8x32xf32, #tpu.memory_space<vmem>>, vector<8x32xf32>
    %18 = vector.extract_strided_slice %15 {offsets = [0, 0], sizes = [8, 8], strides = [1, 1]} : vector<8x32xf32> to vector<8x8xf32>
    %19 = vector.extract_strided_slice %16 {offsets = [0, 0], sizes = [8, 8], strides = [1, 1]} : vector<8x32xf32> to vector<8x8xf32>
    %20 = vector.extract_strided_slice %17 {offsets = [0, 0], sizes = [8, 8], strides = [1, 1]} : vector<8x32xf32> to vector<8x8xf32>
    %cst_14 = arith.constant dense<0.000000e+00> : vector<8x8xf32>
    %21 = tpu.matmul %18, %19, %cst_14 {dimension_numbers = #tpu.dot_dimension_numbers<[1], [1], [0], [0], [0, 0, 1, 0], [], []>} : vector<8x8xf32>, vector<8x8xf32>, vector<8x8xf32> -> vector<8x8xf32>
    %cst_15 = arith.constant dense<0xFF800000> : vector<8xf32>
    %22 = vector.multi_reduction <maximumf>, %21, %cst_15 [1] : vector<8x8xf32> to vector<8xf32>
    %23 = vector.shape_cast %22 : vector<8xf32> to vector<8x1xf32>
    %24 = vector.broadcast %23 : vector<8x1xf32> to vector<8x8xf32>
    %25 = arith.subf %21, %24 : vector<8x8xf32>
    %26 = math.exp %25 : vector<8x8xf32>
    %cst_16 = arith.constant dense<0.000000e+00> : vector<8xf32>
    %27 = vector.multi_reduction <add>, %26, %cst_16 [1] : vector<8x8xf32> to vector<8xf32>
    %28 = vector.shape_cast %27 : vector<8xf32> to vector<8x1xf32>
    %29 = tpu.reciprocal %28 {approx = true} : vector<8x1xf32> -> vector<8x1xf32>
    %30 = vector.broadcast %29 : vector<8x1xf32> to vector<8x8xf32>
    %31 = arith.mulf %26, %30 : vector<8x8xf32>
    %cst_17 = arith.constant dense<0.000000e+00> : vector<8x8xf32>
    %32 = tpu.matmul %31, %20, %cst_17 {dimension_numbers = #tpu.dot_dimension_numbers<[1], [0], [0], [1], [0, 0, 1, 1], [], []>} : vector<8x8xf32>, vector<8x8xf32>, vector<8x8xf32> -> vector<8x8xf32>
    %c0_18 = arith.constant 0 : index
    %c0_19 = arith.constant 0 : index
    %33 = vector.load %arg20[%c0_18, %c0_19] : memref<8x32xf32, #tpu.memory_space<vmem>>, vector<8x8xf32>
    tpu.vector_store %arg20[%c0_18, %c0_19], %32 {strides = array<i32>} : memref<8x32xf32, #tpu.memory_space<vmem>>, vector<8x8xf32>,
    %34 = vector.extract_strided_slice %15 {offsets = [0, 8], sizes = [8, 8], strides = [1, 1]} : vector<8x32xf32> to vector<8x8xf32>
    %35 = vector.extract_strided_slice %16 {offsets = [0, 8], sizes = [8, 8], strides = [1, 1]} : vector<8x32xf32> to vector<8x8xf32>
    %36 = vector.extract_strided_slice %17 {offsets = [0, 8], sizes = [8, 8], strides = [1, 1]} : vector<8x32xf32> to vector<8x8xf32>
    %cst_20 = arith.constant dense<0.000000e+00> : vector<8x8xf32>
    %37 = tpu.matmul %34, %35, %cst_20 {dimension_numbers = #tpu.dot_dimension_numbers<[1], [1], [0], [0], [0, 0, 1, 0], [], []>} : vector<8x8xf32>, vector<8x8xf32>, vector<8x8xf32> -> vector<8x8xf32>
    %cst_21 = arith.constant dense<0xFF800000> : vector<8xf32>
    %38 = vector.multi_reduction <maximumf>, %37, %cst_21 [1] : vector<8x8xf32> to vector<8xf32>
    %39 = vector.shape_cast %38 : vector<8xf32> to vector<8x1xf32>
    %40 = vector.broadcast %39 : vector<8x1xf32> to vector<8x8xf32>
    %41 = arith.subf %37, %40 : vector<8x8xf32>
    %42 = math.exp %41 : vector<8x8xf32>
    %cst_22 = arith.constant dense<0.000000e+00> : vector<8xf32>
    %43 = vector.multi_reduction <add>, %42, %cst_22 [1] : vector<8x8xf32> to vector<8xf32>
    %44 = vector.shape_cast %43 : vector<8xf32> to vector<8x1xf32>
    %45 = tpu.reciprocal %44 {approx = true} : vector<8x1xf32> -> vector<8x1xf32>
    %46 = vector.broadcast %45 : vector<8x1xf32> to vector<8x8xf32>
    %47 = arith.mulf %42, %46 : vector<8x8xf32>
    %cst_23 = arith.constant dense<0.000000e+00> : vector<8x8xf32>
    %48 = tpu.matmul %47, %36, %cst_23 {dimension_numbers = #tpu.dot_dimension_numbers<[1], [0], [0], [1], [0, 0, 1, 1], [], []>} : vector<8x8xf32>, vector<8x8xf32>, vector<8x8xf32> -> vector<8x8xf32>
    %c0_24 = arith.constant 0 : index
    %c8 = arith.constant 8 : index
    %49 = vector.load %arg20[%c0_24, %c8] : memref<8x32xf32, #tpu.memory_space<vmem>>, vector<8x8xf32>
    tpu.vector_store %arg20[%c0_24, %c8], %48 {strides = array<i32>} : memref<8x32xf32, #tpu.memory_space<vmem>>, vector<8x8xf32>,
    %50 = vector.extract_strided_slice %15 {offsets = [0, 16], sizes = [8, 8], strides = [1, 1]} : vector<8x32xf32> to vector<8x8xf32>
    %51 = vector.extract_strided_slice %16 {offsets = [0, 16], sizes = [8, 8], strides = [1, 1]} : vector<8x32xf32> to vector<8x8xf32>
    %52 = vector.extract_strided_slice %17 {offsets = [0, 16], sizes = [8, 8], strides = [1, 1]} : vector<8x32xf32> to vector<8x8xf32>
    %cst_25 = arith.constant dense<0.000000e+00> : vector<8x8xf32>
    %53 = tpu.matmul %50, %51, %cst_25 {dimension_numbers = #tpu.dot_dimension_numbers<[1], [1], [0], [0], [0, 0, 1, 0], [], []>} : vector<8x8xf32>, vector<8x8xf32>, vector<8x8xf32> -> vector<8x8xf32>
    %cst_26 = arith.constant dense<0xFF800000> : vector<8xf32>
    %54 = vector.multi_reduction <maximumf>, %53, %cst_26 [1] : vector<8x8xf32> to vector<8xf32>
    %55 = vector.shape_cast %54 : vector<8xf32> to vector<8x1xf32>
    %56 = vector.broadcast %55 : vector<8x1xf32> to vector<8x8xf32>
    %57 = arith.subf %53, %56 : vector<8x8xf32>
    %58 = math.exp %57 : vector<8x8xf32>
    %cst_27 = arith.constant dense<0.000000e+00> : vector<8xf32>
    %59 = vector.multi_reduction <add>, %58, %cst_27 [1] : vector<8x8xf32> to vector<8xf32>
    %60 = vector.shape_cast %59 : vector<8xf32> to vector<8x1xf32>
    %61 = tpu.reciprocal %60 {approx = true} : vector<8x1xf32> -> vector<8x1xf32>
    %62 = vector.broadcast %61 : vector<8x1xf32> to vector<8x8xf32>
    %63 = arith.mulf %58, %62 : vector<8x8xf32>
    %cst_28 = arith.constant dense<0.000000e+00> : vector<8x8xf32>
    %64 = tpu.matmul %63, %52, %cst_28 {dimension_numbers = #tpu.dot_dimension_numbers<[1], [0], [0], [1], [0, 0, 1, 1], [], []>} : vector<8x8xf32>, vector<8x8xf32>, vector<8x8xf32> -> vector<8x8xf32>
    %c0_29 = arith.constant 0 : index
    %c16 = arith.constant 16 : index
    %65 = vector.load %arg20[%c0_29, %c16] : memref<8x32xf32, #tpu.memory_space<vmem>>, vector<8x8xf32>
    tpu.vector_store %arg20[%c0_29, %c16], %64 {strides = array<i32>} : memref<8x32xf32, #tpu.memory_space<vmem>>, vector<8x8xf32>,
    %66 = vector.extract_strided_slice %15 {offsets = [0, 24], sizes = [8, 8], strides = [1, 1]} : vector<8x32xf32> to vector<8x8xf32>
    %67 = vector.extract_strided_slice %16 {offsets = [0, 24], sizes = [8, 8], strides = [1, 1]} : vector<8x32xf32> to vector<8x8xf32>
    %68 = vector.extract_strided_slice %17 {offsets = [0, 24], sizes = [8, 8], strides = [1, 1]} : vector<8x32xf32> to vector<8x8xf32>
    %cst_30 = arith.constant dense<0.000000e+00> : vector<8x8xf32>
    %69 = tpu.matmul %66, %67, %cst_30 {dimension_numbers = #tpu.dot_dimension_numbers<[1], [1], [0], [0], [0, 0, 1, 0], [], []>} : vector<8x8xf32>, vector<8x8xf32>, vector<8x8xf32> -> vector<8x8xf32>
    %cst_31 = arith.constant dense<0xFF800000> : vector<8xf32>
    %70 = vector.multi_reduction <maximumf>, %69, %cst_31 [1] : vector<8x8xf32> to vector<8xf32>
    %71 = vector.shape_cast %70 : vector<8xf32> to vector<8x1xf32>
    %72 = vector.broadcast %71 : vector<8x1xf32> to vector<8x8xf32>
    %73 = arith.subf %69, %72 : vector<8x8xf32>
    %74 = math.exp %73 : vector<8x8xf32>
    %cst_32 = arith.constant dense<0.000000e+00> : vector<8xf32>
    %75 = vector.multi_reduction <add>, %74, %cst_32 [1] : vector<8x8xf32> to vector<8xf32>
    %76 = vector.shape_cast %75 : vector<8xf32> to vector<8x1xf32>
    %77 = tpu.reciprocal %76 {approx = true} : vector<8x1xf32> -> vector<8x1xf32>
    %78 = vector.broadcast %77 : vector<8x1xf32> to vector<8x8xf32>
    %79 = arith.mulf %74, %78 : vector<8x8xf32>
    %cst_33 = arith.constant dense<0.000000e+00> : vector<8x8xf32>
    %80 = tpu.matmul %79, %68, %cst_33 {dimension_numbers = #tpu.dot_dimension_numbers<[1], [0], [0], [1], [0, 0, 1, 1], [], []>} : vector<8x8xf32>, vector<8x8xf32>, vector<8x8xf32> -> vector<8x8xf32>
    %c0_34 = arith.constant 0 : index
    %c24 = arith.constant 24 : index
    %81 = vector.load %arg20[%c0_34, %c24] : memref<8x32xf32, #tpu.memory_space<vmem>>, vector<8x8xf32>
    tpu.vector_store %arg20[%c0_34, %c24], %80 {strides = array<i32>} : memref<8x32xf32, #tpu.memory_space<vmem>>, vector<8x8xf32>,
    %c0_35 = arith.constant 0 : index
    %c0_36 = arith.constant 0 : index
    %82 = vector.load %arg20[%c0_35, %c0_36] : memref<8x32xf32, #tpu.memory_space<vmem>>, vector<8x32xf32>
    %83 = arith.addf %8, %82 : vector<8x32xf32>
    %c0_37 = arith.constant 0 : index
    %c0_38 = arith.constant 0 : index
    %84 = vector.load %arg9[%c0_37, %c0_38] : memref<1x32xf32, #tpu.memory_space<vmem>>, vector<1x32xf32>
    %c0_39 = arith.constant 0 : index
    %c0_40 = arith.constant 0 : index
    %85 = vector.load %arg10[%c0_39, %c0_40] : memref<1x32xf32, #tpu.memory_space<vmem>>, vector<1x32xf32>
    %cst_41 = arith.constant dense<0.000000e+00> : vector<8xf32>
    %86 = vector.multi_reduction <add>, %83, %cst_41 [1] : vector<8x32xf32> to vector<8xf32>
    %87 = vector.shape_cast %86 : vector<8xf32> to vector<8x1xf32>
    %cst_42 = arith.constant 3.200000e+01 : f32
    %88 = vector.broadcast %cst_42 : f32 to vector<8x1xf32>
    %89 = arith.divf %87, %88 : vector<8x1xf32>
    %90 = vector.broadcast %89 : vector<8x1xf32> to vector<8x32xf32>
    %91 = arith.subf %83, %90 : vector<8x32xf32>
    %92 = arith.mulf %91, %91 : vector<8x32xf32>
    %cst_43 = arith.constant dense<0.000000e+00> : vector<8xf32>
    %93 = vector.multi_reduction <add>, %92, %cst_43 [1] : vector<8x32xf32> to vector<8xf32>
    %94 = vector.shape_cast %93 : vector<8xf32> to vector<8x1xf32>
    %cst_44 = arith.constant 3.200000e+01 : f32
    %95 = vector.broadcast %cst_44 : f32 to vector<8x1xf32>
    %96 = arith.divf %94, %95 : vector<8x1xf32>
    %cst_45 = arith.constant 9.99999974E-6 : f32
    %97 = vector.broadcast %cst_45 : f32 to vector<8x1xf32>
    %98 = arith.addf %96, %97 : vector<8x1xf32>
    %99 = math.rsqrt %98 : vector<8x1xf32>
    %100 = vector.broadcast %89 : vector<8x1xf32> to vector<8x32xf32>
    %101 = arith.subf %83, %100 : vector<8x32xf32>
    %102 = vector.broadcast %99 : vector<8x1xf32> to vector<8x32xf32>
    %103 = arith.mulf %101, %102 : vector<8x32xf32>
    %104 = vector.broadcast %84 : vector<1x32xf32> to vector<8x32xf32>
    %105 = arith.mulf %103, %104 : vector<8x32xf32>
    %106 = vector.broadcast %85 : vector<1x32xf32> to vector<8x32xf32>
    %107 = arith.addf %105, %106 : vector<8x32xf32>
    %c0_46 = arith.constant 0 : index
    %c0_47 = arith.constant 0 : index
    %108 = vector.load %arg11[%c0_46, %c0_47] : memref<32x64xf32, #tpu.memory_space<vmem>>, vector<32x64xf32>
    %cst_48 = arith.constant dense<0.000000e+00> : vector<8x64xf32>
    %109 = tpu.matmul %107, %108, %cst_48 {dimension_numbers = #tpu.dot_dimension_numbers<[1], [0], [0], [1], [0, 0, 1, 1], [], []>} : vector<8x32xf32>, vector<32x64xf32>, vector<8x64xf32> -> vector<8x64xf32>
    %c0_49 = arith.constant 0 : index
    %c0_50 = arith.constant 0 : index
    %110 = vector.load %arg12[%c0_49, %c0_50] : memref<1x64xf32, #tpu.memory_space<vmem>>, vector<1x64xf32>
    %111 = vector.broadcast %110 : vector<1x64xf32> to vector<8x64xf32>
    %112 = arith.addf %109, %111 : vector<8x64xf32>
    %cst_51 = arith.constant 0.000000e+00 : f32
    %113 = vector.broadcast %cst_51 : f32 to vector<8x64xf32>
    %114 = arith.maximumf %112, %113 : vector<8x64xf32>
    %c0_52 = arith.constant 0 : index
    %c0_53 = arith.constant 0 : index
    %115 = vector.load %arg13[%c0_52, %c0_53] : memref<64x32xf32, #tpu.memory_space<vmem>>, vector<64x32xf32>
    %cst_54 = arith.constant dense<0.000000e+00> : vector<8x32xf32>
    %116 = tpu.matmul %114, %115, %cst_54 {dimension_numbers = #tpu.dot_dimension_numbers<[1], [0], [0], [1], [0, 0, 1, 1], [], []>} : vector<8x64xf32>, vector<64x32xf32>, vector<8x32xf32> -> vector<8x32xf32>
    %c0_55 = arith.constant 0 : index
    %c0_56 = arith.constant 0 : index
    %117 = vector.load %arg14[%c0_55, %c0_56] : memref<1x32xf32, #tpu.memory_space<vmem>>, vector<1x32xf32>
    %118 = vector.broadcast %117 : vector<1x32xf32> to vector<8x32xf32>
    %119 = arith.addf %116, %118 : vector<8x32xf32>
    %120 = arith.addf %107, %119 : vector<8x32xf32>
    %c0_57 = arith.constant 0 : index
    %c0_58 = arith.constant 0 : index
    %121 = vector.load %arg15[%c0_57, %c0_58] : memref<1x32xf32, #tpu.memory_space<vmem>>, vector<1x32xf32>
    %c0_59 = arith.constant 0 : index
    %c0_60 = arith.constant 0 : index
    %122 = vector.load %arg16[%c0_59, %c0_60] : memref<1x32xf32, #tpu.memory_space<vmem>>, vector<1x32xf32>
    %cst_61 = arith.constant dense<0.000000e+00> : vector<8xf32>
    %123 = vector.multi_reduction <add>, %120, %cst_61 [1] : vector<8x32xf32> to vector<8xf32>
    %124 = vector.shape_cast %123 : vector<8xf32> to vector<8x1xf32>
    %cst_62 = arith.constant 3.200000e+01 : f32
    %125 = vector.broadcast %cst_62 : f32 to vector<8x1xf32>
    %126 = arith.divf %124, %125 : vector<8x1xf32>
    %127 = vector.broadcast %126 : vector<8x1xf32> to vector<8x32xf32>
    %128 = arith.subf %120, %127 : vector<8x32xf32>
    %129 = arith.mulf %128, %128 : vector<8x32xf32>
    %cst_63 = arith.constant dense<0.000000e+00> : vector<8xf32>
    %130 = vector.multi_reduction <add>, %129, %cst_63 [1] : vector<8x32xf32> to vector<8xf32>
    %131 = vector.shape_cast %130 : vector<8xf32> to vector<8x1xf32>
    %cst_64 = arith.constant 3.200000e+01 : f32
    %132 = vector.broadcast %cst_64 : f32 to vector<8x1xf32>
    %133 = arith.divf %131, %132 : vector<8x1xf32>
    %cst_65 = arith.constant 9.99999974E-6 : f32
    %134 = vector.broadcast %cst_65 : f32 to vector<8x1xf32>
    %135 = arith.addf %133, %134 : vector<8x1xf32>
    %136 = math.rsqrt %135 : vector<8x1xf32>
    %137 = vector.broadcast %126 : vector<8x1xf32> to vector<8x32xf32>
    %138 = arith.subf %120, %137 : vector<8x32xf32>
    %139 = vector.broadcast %136 : vector<8x1xf32> to vector<8x32xf32>
    %140 = arith.mulf %138, %139 : vector<8x32xf32>
    %141 = vector.broadcast %121 : vector<1x32xf32> to vector<8x32xf32>
    %142 = arith.mulf %140, %141 : vector<8x32xf32>
    %143 = vector.broadcast %122 : vector<1x32xf32> to vector<8x32xf32>
    %144 = arith.addf %142, %143 : vector<8x32xf32>
    %145 = arith.addf %144, %8 : vector<8x32xf32>
    %c0_66 = arith.constant 0 : index
    %c0_67 = arith.constant 0 : index
    %c0_68 = arith.constant 0 : index
    %146 = vector.load %arg17[%c0_66, %c0_67, %c0_68] : memref<1x8x32xf32, #tpu.memory_space<vmem>>, vector<1x8x32xf32>
    %147 = vector.shape_cast %146 : vector<1x8x32xf32> to vector<8x32xf32>
    %148 = vector.shape_cast %145 : vector<8x32xf32> to vector<1x8x32xf32>
    tpu.vector_store %arg17[%c0_66, %c0_67, %c0_68], %148 {strides = array<i32>} : memref<1x8x32xf32, #tpu.memory_space<vmem>>, vector<1x8x32xf32>,
    return
  }
  func.func @transform_0(%arg0: i32, %arg1: i32) -> (i32, i32, i32) {
    %c0_i32 = arith.constant 0 : i32
    %c0_i32_0 = arith.constant 0 : i32
    %c0_i32_1 = arith.constant 0 : i32
    return %arg0, %c0_i32, %c0_i32_0 : i32, i32, i32
  }
  func.func @transform_1(%arg0: i32, %arg1: i32) -> (i32, i32) {
    %c0_i32 = arith.constant 0 : i32
    %c0_i32_0 = arith.constant 0 : i32
    %c0_i32_1 = arith.constant 0 : i32
    return %c0_i32, %c0_i32_0 : i32, i32
  }
  func.func @transform_2(%arg0: i32, %arg1: i32) -> (i32, i32) {
    %c0_i32 = arith.constant 0 : i32
    %c0_i32_0 = arith.constant 0 : i32
    %c0_i32_1 = arith.constant 0 : i32
    return %c0_i32, %c0_i32_0 : i32, i32
  }
  func.func @transform_3(%arg0: i32, %arg1: i32) -> (i32, i32) {
    %c0_i32 = arith.constant 0 : i32
    %c0_i32_0 = arith.constant 0 : i32
    %c0_i32_1 = arith.constant 0 : i32
    return %c0_i32, %c0_i32_0 : i32, i32
  }
  func.func @transform_4(%arg0: i32, %arg1: i32) -> (i32, i32) {
    %c0_i32 = arith.constant 0 : i32
    %c0_i32_0 = arith.constant 0 : i32
    %c0_i32_1 = arith.constant 0 : i32
    return %c0_i32, %c0_i32_0 : i32, i32
  }
  func.func @transform_5(%arg0: i32, %arg1: i32) -> (i32, i32) {
    %c0_i32 = arith.constant 0 : i32
    %c0_i32_0 = arith.constant 0 : i32
    %c0_i32_1 = arith.constant 0 : i32
    return %c0_i32, %c0_i32_0 : i32, i32
  }
  func.func @transform_6(%arg0: i32, %arg1: i32) -> (i32, i32) {
    %c0_i32 = arith.constant 0 : i32
    %c0_i32_0 = arith.constant 0 : i32
    %c0_i32_1 = arith.constant 0 : i32
    return %c0_i32, %c0_i32_0 : i32, i32
  }
  func.func @transform_7(%arg0: i32, %arg1: i32) -> (i32, i32) {
    %c0_i32 = arith.constant 0 : i32
    %c0_i32_0 = arith.constant 0 : i32
    %c0_i32_1 = arith.constant 0 : i32
    return %c0_i32, %c0_i32_0 : i32, i32
  }
  func.func @transform_8(%arg0: i32, %arg1: i32) -> (i32, i32) {
    %c0_i32 = arith.constant 0 : i32
    %c0_i32_0 = arith.constant 0 : i32
    %c0_i32_1 = arith.constant 0 : i32
    return %c0_i32, %c0_i32_0 : i32, i32
  }
  func.func @transform_9(%arg0: i32, %arg1: i32) -> (i32, i32) {
    %c0_i32 = arith.constant 0 : i32
    %c0_i32_0 = arith.constant 0 : i32
    %c0_i32_1 = arith.constant 0 : i32
    return %c0_i32, %c0_i32_0 : i32, i32
  }
  func.func @transform_10(%arg0: i32, %arg1: i32) -> (i32, i32) {
    %c0_i32 = arith.constant 0 : i32
    %c0_i32_0 = arith.constant 0 : i32
    %c0_i32_1 = arith.constant 0 : i32
    return %c0_i32, %c0_i32_0 : i32, i32
  }
  func.func @transform_11(%arg0: i32, %arg1: i32) -> (i32, i32) {
    %c0_i32 = arith.constant 0 : i32
    %c0_i32_0 = arith.constant 0 : i32
    %c0_i32_1 = arith.constant 0 : i32
    return %c0_i32, %c0_i32_0 : i32, i32
  }
  func.func @transform_12(%arg0: i32, %arg1: i32) -> (i32, i32) {
    %c0_i32 = arith.constant 0 : i32
    %c0_i32_0 = arith.constant 0 : i32
    %c0_i32_1 = arith.constant 0 : i32
    return %c0_i32, %c0_i32_0 : i32, i32
  }
  func.func @transform_13(%arg0: i32, %arg1: i32) -> (i32, i32) {
    %c0_i32 = arith.constant 0 : i32
    %c0_i32_0 = arith.constant 0 : i32
    %c0_i32_1 = arith.constant 0 : i32
    return %c0_i32, %c0_i32_0 : i32, i32
  }
  func.func @transform_14(%arg0: i32, %arg1: i32) -> (i32, i32) {
    %c0_i32 = arith.constant 0 : i32
    %c0_i32_0 = arith.constant 0 : i32
    %c0_i32_1 = arith.constant 0 : i32
    return %c0_i32, %c0_i32_0 : i32, i32
  }
  func.func @transform_15(%arg0: i32, %arg1: i32) -> (i32, i32, i32) {
    %c0_i32 = arith.constant 0 : i32
    %c0_i32_0 = arith.constant 0 : i32
    return %arg0, %arg1, %c0_i32 : i32, i32, i32
  }
}

</mosaic_0001>

<bundles_post_ra>
// kernel: tpu_custom_call.1
= control target key start
LH: loop header
LB: loop body
LE: loop exit
PB: predicated region body
PF: predicated region fallthrough
CT: control target
= control target key end

     0   :  { %s2791_s0 = inlined_call_operand.hbm [shape: f32[2,8,32], index: 0, kind: input, shape index: {}]   ;;  %s2792_s1 = inlined_call_operand.vmem [shape: f32[32,32], index: 1, kind: input, shape index: {}]   ;;  %s2793_s2 = inlined_call_operand.vmem [shape: f32[1,32], index: 2, kind: input, shape index: {}]   ;;  %s2794_s3 = inlined_call_operand.vmem [shape: f32[32,32], index: 3, kind: input, shape index: {}]   ;;  %s2795_s4 = inlined_call_operand.vmem [shape: f32[1,32], index: 4, kind: input, shape index: {}]   ;;  %s2796_s5 = inlined_call_operand.vmem [shape: f32[32,32], index: 5, kind: input, shape index: {}]   ;;  %s2797_s6 = inlined_call_operand.vmem [shape: f32[1,32], index: 6, kind: input, shape index: {}]   ;;  %s2798_s7 = inlined_call_operand.vmem [shape: f32[1,32], index: 7, kind: input, shape index: {}]   ;;  %s2799_s8 = inlined_call_operand.vmem [shape: f32[1,32], index: 8, kind: input, shape index: {}]   ;;  %s2800_s9 = inlined_call_operand.hbm [shape: f32[32,64], index: 9, kind: input, shape index: {}]   ;;  %s2801_s10 = inlined_call_operand.vmem [shape: f32[1,64], index: 10, kind: input, shape index: {}]   ;;  %s2802_s11 = inlined_call_operand.vmem [shape: f32[64,32], index: 11, kind: input, shape index: {}]   ;;  %s2803_s12 = inlined_call_operand.vmem [shape: f32[1,32], index: 12, kind: input, shape index: {}]   ;;  %s2804_s13 = inlined_call_operand.vmem [shape: f32[1,32], index: 13, kind: input, shape index: {}]   ;;  %s2805_s14 = inlined_call_operand.vmem [shape: f32[1,32], index: 14, kind: input, shape index: {}]   ;;  %s2806_s15 = inlined_call_operand.hbm [shape: f32[2,8,32], index: 15, kind: output, shape index: {}]  }
   0x1   :  { %2815 = sst [smem:[#allocation18_spill]] %s2791_s0 }
   0x2   :  { %2816 = sst [smem:[#allocation19_spill]] %s2800_s9 }
   0x3   :  { %2817 = sst [smem:[#allocation20_spill]] %s2801_s10 }
   0x4   :  { %2818 = sst [smem:[#allocation21_spill]] %s2803_s12 }
   0x5   :  { %2819 = sst [smem:[#allocation22_spill]] %s2804_s13 }
   0x6   :  { %2820 = sst [smem:[#allocation23_spill]] %s2805_s14 }
   0x7   :  { %2821 = sst [smem:[#allocation24_spill]] %s2806_s15 }
   0x8   :  { %20 = vsyncpa [#allocation6], 0 }
   0x9   :  { %22 = vsyncpa [#allocation6 + $0x1], 0 }
   0xa   :  { %23 = vsyncpa [#allocation9], 0 }
   0xb   :  { %24 = vsyncpa [#allocation7], 0 }
   0xc   :  { %26 = vsyncpa [#allocation7 + $0x1], 0  ;;  %s2392_s18 = smov 0   ;;  %s2394_s19 = smov 0  }
   0xd   :  { %s2396_s20 = smov 0   ;;  %s2398_s21 = smov 0  }
   0xe   :  { %s2400_s22 = smov 0   ;;  %s2402_s23 = smov 0  }
   0xf LB: > { %2822 = sst [smem:[#allocation14_spill]] %s2276_s18  ;;  %s1823_s24 = sadd.s32 4294967295, %s2296_s23   ;;  %s2296_s23 = sphi %s2402_s23, %s32_s23   ;;  %s2292_s22 = sphi %s2400_s22, %s2856_s22   ;;  %s2288_s21 = sphi %s2398_s21, %s2855_s21   ;;  %s2284_s20 = sphi %s2396_s20, %s2854_s20   ;;  %s2280_s19 = sphi %s2394_s19, %s2853_s19   ;;  %s2276_s18 = sphi %s2392_s18, %s2852_s18  }
  0x10   : > { %2823 = sst [smem:[#allocation15_spill]] %s2288_s21  ;;  %s1824_s25 = sadd.s32 4294967294, %s2296_s23  }
  0x11   : > { %p64_p0 = scmp.ne.s32.totalorder %s2280_s19, %s2276_s18  ;;  %p2426_p1 = scmp.eq.s32.totalorder %s1823_s24, 0 }
  0x12   : > { %p2430_p2 = scmp.eq.s32.totalorder %s1823_s24, 1  ;;  %p390_p3 = scmp.eq.s32.totalorder %s1824_s25, 1 }
  0x13   : > { %s2824_s26 = scalar_select %p2426_p1, 1, 0 }
  0x14   : > { %s2825_s27 = scalar_select %p2430_p2, 1, 0 }
  0x15   : > { %p2436_p4 = por %p2426_p1, %p64_p0  ;;  %p1825_p5 = scmp.ge.s32.totalorder %s2296_s23, 1 }
  0x16   : > { %p2441_p6 = por %p390_p3, %p64_p0  ;;  %p397_p7 = scmp.lt.s32.totalorder %s2296_s23, 3 }
  0x17   : > { %s2826_s28 = scalar_select %p2436_p4, 1, 0 }
  0x18   : > { %s2827_s29 = scalar_select %p2441_p6, 1, 0 }
  0x19   : > { %p2446_p8 = pnand %p1825_p5, %p397_p7  ;;  %s2298_s16 = smov [#allocation8]  }
  0x1a   : > { %2828 = sst [smem:[#allocation16_spill]] %s2827_s29  ;;  %s433_s17 = sshll.u32 %s2298_s16, 4  ;;  %s434_s17 = int_to_ptr.vmem [resolvable:$true] %s433_s17 }
  0x1b   : > { %s2829_s30 = scalar_select %p2446_p8, 1, 0 }
  0x1c   : > { %p2056_p9 = pneg %p2446_p8  ;;  %s44_s25 = sadd.s32 1, %s2292_s22 }
  0x1d   : > { %s2831_s9 = sld [smem:[#allocation19_spill]] }
  0x1e   : > { %p2455_p11 = pnand %p2056_p9, %p2426_p1 }
  0x20   : > { %p2154_p13 = pneg %p2455_p11 }
  0x23   : > { %s2152_s15 = scalar_lea.hbm %s2831_s9, 512 }
  0x24   : > { %p2153_p12 = scmp.ne.s32.totalorder %s2831_s9, %s2152_s15  ;;  %p2159_p5 = scmp.lt.u32.totalorder %s2152_s15, %s2831_s9 }
  0x26   : > { %p2155_p0 = pnand %p2154_p13, %p2153_p12 }
  0x28   : > { %p2156_p3 = pneg %p2155_p0 }
  0x2a   : > { %p2161_p7 = pnand %p2159_p5, %p2156_p3 }
  0x2c   : > { %2164 = shalt.err (!%p2161_p7)
}
  0x2d   : > { %s2165_s12 = scalar_lea.vmem %s434_s17, 512  ;;  %p2173_p1 = scmp.lt.s32.totalorder %s434_s17, %s434_s17 }
  0x2e   : > { %p2166_p9 = scmp.ne.s32.totalorder %s434_s17, %s2165_s12  ;;  %p2174_p4 = scmp.lt.s32.totalorder %s2165_s12, %s2165_s12 }
  0x30   : > { %p2168_p10 = pnand %p2166_p9, %p2154_p13  ;;  %p2175_p8 = por %p2174_p4, %p2173_p1 }
  0x32   : > { %p2169_p6 = pneg %p2168_p10 }
  0x34   : > { %p2176_p2 = pnand %p2175_p8, %p2169_p6 }
  0x36   : > { %2179 = shalt.err (!%p2176_p2)
}
  0x37   : > { %s2299_s13 = smov 128   ;;  %s2300_s14 = smov 8  }
  0x38   : > { %2059 = dma.hbm_to_vmem [thread:$0]  (!%p2455_p11), %s2831_s9, 512, %s434_s17, [#allocation9], %s2299_s13, %s2299_s13, %s2300_s14  }
  0x39   : > { %p46_p1 = scmp.ge.s32.totalorder %s44_s25, 2  ;;  %s51_s12 = sadd.s32 1, %s2284_s20 }
  0x3a   : > { %p58_p2 = scmp.ne.s32.totalorder %s2284_s20, %s2280_s19  ;;  %p59_p4 = scmp.eq.s32.totalorder %s2296_s23, 0 }
  0x3b   : > { %s2858_s25 = smov (%p46_p1, %s44_s25), 0  ;;  %p2834_p8 = scmp.ne.s32.totalorder %s2825_s27, 0 }
  0x3c   : > { %2832 = sst [smem:[#allocation17_spill]] %s2858_s25  ;;  %p2482_p6 = por %p59_p4, %p58_p2 }
  0x3d   : > { %p2488_p10 = por %p2834_p8, %p58_p2  ;;  %s48_s24 = ssub.s32 %s2292_s22, %s2858_s25 }
  0x3e   : > { %p2069_p12 = scmp.lt.s32.totalorder %s2296_s23, 2  ;;  %p49_p11 = scmp.eq.s32.totalorder %s48_s24, 0 }
  0x3f   : > { %s462_s17 = sand.u32 1, %s2284_s20   ;;  %s1829_s14 = sshll.u32 %s2292_s22, 7 }
  0x40   : > { %s1828_s16 = sshll.u32 %s462_s17, 3  ;;  %s2836_s0 = sld [smem:[#allocation18_spill]] }
  0x41   : > { %s2497_s13 = scalar_select %p49_p11, %s2284_s20, %s51_s12  }
  0x42   : > { %s466_s27 = scalar_lea.vmem [#allocation5], %s1828_s16  ;;  %p2509_p13 = pnand %p2069_p12, %p2482_p6 }
  0x43   : > { %s473_s10 = sshll.u32 %s466_s27, 4  ;;  %s463_s12 = scalar_lea.sflag [#allocation6], %s462_s17  ;;  %s2505_s10 = int_to_ptr.vmem [resolvable:$true] %s473_s10 }
  0x44   : > { %p2182_p3 = pneg %p2509_p13 }
  0x46   : > { %s2503_s9 = scalar_lea.hbm %s2836_s0, %s1829_s14  ;;  %s2185_s15 = scalar_lea.hbm %s2836_s0, 256 }
  0x47   : > { %s2180_s25 = scalar_lea.hbm %s2503_s9, 128  ;;  %p2186_p9 = scmp.lt.u32.totalorder %s2503_s9, %s2836_s0 }
  0x48   : > { %p2181_p0 = scmp.ne.s32.totalorder %s2503_s9, %s2180_s25  ;;  %p2187_p1 = scmp.lt.u32.totalorder %s2185_s15, %s2180_s25 }
  0x49   : > { %p2189_p4 = scmp.lt.u32.totalorder %s2180_s25, %s2503_s9 }
  0x4a   : > { %p2183_p5 = pnand %p2182_p3, %p2181_p0  ;;  %p2188_p2 = por %p2187_p1, %p2186_p9 }
  0x4c   : > { %p2184_p7 = pneg %p2183_p5  ;;  %p2190_p6 = por %p2189_p4, %p2188_p2 }
  0x4e   : > { %p2191_p8 = pnand %p2190_p6, %p2184_p7 }
  0x50   : > { %2194 = shalt.err (!%p2191_p8)
}
  0x51   : > { %s2195_s17 = scalar_lea.vmem %s2505_s10, 128  ;;  %s2301_s27 = smov [#allocation5]  }
  0x52   : > { %p2196_p12 = scmp.ne.s32.totalorder %s2505_s10, %s2195_s17  ;;  %s2200_s16 = sshll.u32 %s2301_s27, 4  ;;  %s2201_s16 = int_to_ptr.vmem [resolvable:$false] %s2200_s16 }
  0x53   : > { %s2202_s14 = scalar_lea.vmem %s2201_s16, 256  ;;  %p2203_p5 = scmp.lt.s32.totalorder %s2505_s10, %s2201_s16 }
  0x54   : > { %p2198_p11 = pnand %p2196_p12, %p2182_p3  ;;  %p2204_p9 = scmp.lt.s32.totalorder %s2202_s14, %s2195_s17 }
  0x56   : > { %p2199_p0 = pneg %p2198_p11  ;;  %p2205_p1 = por %p2204_p9, %p2203_p5 }
  0x58   : > { %p2206_p2 = pnand %p2205_p1, %p2199_p0 }
  0x5a   : > { %2209 = shalt.err (!%p2206_p2)
}
  0x5b   : > { %2063 = dma.hbm_to_vmem [thread:$0]  (!%p2509_p13), %s2503_s9, 128, %s2505_s10, %s463_s12  }
  0x5c   : > { %p2838_p7 = scmp.ne.s32.totalorder %s2829_s30, 0 }
  0x5d   : > { %s2541_s25 = sand.u32 (!%p2838_p7), 1, %s2280_s19   ;;  %p2839_p3 = scmp.ne.s32.totalorder (!%p2838_p7), %s2826_s28, 0 }
  0x5e   : > { %482 = sbr.rel (%p2838_p7) target bundleno = 2403 (0x963), region = 80  ;;  %s1831_s15 = sshll.u32 (!%p2838_p7), %s2541_s25, 3 }
  0x5f   : > { %s485_s21 = scalar_lea.sflag (!%p2838_p7), [#allocation6], %s2541_s25  ;;  %s488_s18 = scalar_lea.vmem (!%p2838_p7), [#allocation5], %s1831_s15 }
  0x65   : > { %2263 = dma.done.wait (%p2839_p3), %s485_s21, 128  }
  0x66   : > { %2265 = vsyncadd (%p2839_p3), %s485_s21, 4294967168  ;;  %p2840_p13 = scmp.ne.s32.totalorder %s2824_s26, 0 }
  0x68   : > { %2267 = dma.done.wait (%p2840_p13), [#allocation9], 512  }
  0x69   : > { %2269 = vsyncadd (%p2840_p13), [#allocation9], 4294966784  ;;  %v2302_v0 = vmov 0.0|0.0   ;;  %vm2303_vm0 = vmmov 0   ;;  %v2304_v1 = vmov 0.0   ;;  %v544_v2 = vld [vmem:[%s2794_s3] sm:$0xff] }
  0x6a   : > { %2012 = vmatprep.subr.bf16.mxu0 %v2302_v0  ;;  %1917 = vmatprep.mubr.msk.f32.mxu0 %vm2303_vm0, %v2304_v1  ;;  %v545_v3 = vld [vmem:[%s2794_s3 + $0x8] sm:$0xff]  ;;  %v546_v4 = vld [vmem:[%s2794_s3 + $0x10] sm:$0xff]  ;;  %v547_v6 = vld [vmem:[%s2794_s3 + $0x18] sm:$0xff]  ;;  %vm555_vm1 = vcmask 261120   ;;  %vm803_vm2 = vcmask 64512   ;;  %s2305_s26 = smov 112  }
  0x6b   : > { %2018 = vmatprep.subr.bf16.mxu1 %v2302_v0  ;;  %1928 = vmatprep.mubr.msk.f32.mxu1 %vm2303_vm0, %v2304_v1  ;;  %v2013_v5 = vpack.c.bf16 %v545_v3, %v544_v2  ;;  %v2016_v7 = vpack.c.bf16 %v547_v6, %v546_v4  ;;  %v715_v8 = vld [vmem:[%s2792_s1] sm:$0xff]  ;;  %v716_v9 = vld [vmem:[%s2792_s1 + $0x8] sm:$0xff]  ;;  %v717_v12 = vld [vmem:[%s2792_s1 + $0x10] sm:$0xff]  ;;  %s2307_s30 = smov 104   ;;  %s2308_s17 = smov 8   ;;  %vm1135_vm3 = vcmask 130112  }
  0x6c   : > { %v2580_v10 = vld [vmem:[%s488_s18] sm:$0xff]  ;;  %v2025_v11 = vpack.c.bf16 %v716_v9, %v715_v8  ;;  %v630_v20 = vld [vmem:[%s2796_s5 + $0x8] sm:$0xff]  ;;  %v631_v23 = vld [vmem:[%s2796_s5 + $0x10] sm:$0xff]  ;;  %s2306_s18 = smov 120   ;;  %s2309_s27 = smov 16   ;;  %vm1306_vm4 = vcmask 195712  }
  0x6d   : > { %2014 = vmatpush3.bf16.msra.mxu0 %v2013_v5  ;;  %v718_v13 = vld [vmem:[%s2792_s1 + $0x18] sm:$0xff]  ;;  %v1834_v15 = vld [vmem:[%s2795_s4] ss:$0 sm:$0xff]  ;;  %s2310_s16 = smov 24   ;;  %vm1477_vm5 = vcmask 261312   ;;  %s2841_s12 = sld [smem:[#allocation20_spill]] }
  0x6e   : > { %2015 = vmatprep.subr.bf16.mxu0 %v2302_v0  ;;  %v2028_v14 = vpack.c.bf16 %v718_v13, %v717_v12  ;;  %v629_v19 = vld [vmem:[%s2796_s5] sm:$0xff]  ;;  %v632_v24 = vld [vmem:[%s2796_s5 + $0x18] sm:$0xff]  ;;  %vm1611_vm6 = vcmask 523264   ;;  %s2843_s14 = sld [smem:[#allocation15_spill]]  ;;  %s2844_s10 = sld [smem:[#allocation22_spill]] }
  0x6f   : > { %v2019_v21 = vpack.c.bf16 %v630_v20, %v629_v19  ;;  %v1838_v22 = vld [vmem:[%s2793_s2] ss:$0 sm:$0xff]  ;;  %v2022_v25 = vpack.c.bf16 %v632_v24, %v631_v23  ;;  %s538_s24 = scalar_lea.vmem [#allocation10], %s1831_s15  ;;  %s1718_s21 = scalar_lea.sflag [#allocation7], %s2541_s25 }
  0x70   : > { %v1836_v37 = vld [vmem:[%s2797_s6] ss:$0 sm:$0xff]  ;;  %s2311_s15 = smov [#allocation10]  }
  0x71   : > { %2017 = vmatpush3.bf16.msra.mxu0 %v2016_v7  ;;  %2020 = vmatpush3.bf16.msra.mxu1 %v2019_v21  ;;  %s2214_s9 = sshll.u32 %s2311_s15, 4  ;;  %s2215_s9 = int_to_ptr.vmem [resolvable:$false] %s2214_s9 }
  0x72   : > { %2024 = vmatprep.subr.bf16.mxu0 %v2302_v0  ;;  %2021 = vmatprep.subr.bf16.mxu1 %v2302_v0 }
  0x74   : > { %1918 = vmatmul.mubr.msk.f32.vlgmr.msra.gmra.mrb[0].mxu0 %vm555_vm1, %v2580_v10 }
  0x75   : > { %2026 = vmatpush3.bf16.msra.mxu0 %v2025_v11  ;;  %1939 = vmatprep.mubr.msk.f32.mxu0 %vm2303_vm0, %v2304_v1 }
  0x76   : > { %2027 = vmatprep.subr.bf16.mxu0 %v2302_v0  ;;  %2023 = vmatpush3.bf16.msra.mxu1 %v2022_v25 }
  0x77   : > { %1947 = vmatprep.subr.mxu1 %v2304_v1 }
  0x79   : > { %2029 = vmatpush3.bf16.msra.mxu0 %v2028_v14  ;;  %1929 = vmatmul.mubr.msk.f32.vlgmr.msra.gmra.mrb[0].mxu1 %vm555_vm1, %v2580_v10 }
  0x7a   : > { %1942 = vmatprep.subr.mxu0 %v2304_v1  ;;  %1949 = vmatprep.mubr.msk.f32.mxu1 %vm2303_vm0, %v2304_v1 }
  0x7c   : > { %1940 = vmatmul.mubr.msk.f32.vlgmr.msra.gmra.mrb[2].mxu0 %vm555_vm1, %v2580_v10 }
  0x7d   : > { %1944 = vmatprep.mubr.msk.f32.mxu0 %vm2303_vm0, %v2304_v1 }
 0x147   : > { %v625_v16 = vpop.f32.mrb[0].mxu0 }
 0x148   : > { %v626_v17 = vadd.f32 %v1834_v15, %v625_v16  ;;  %v1919_v18 = vpop.f32.mrb[1].mxu0 }
 0x14a   : > { %710 = vst.msk [vmem:[#allocation2] sm:$0xff] %vm555_vm1, %v626_v17 }
 0x14c   : > { %v706_v38 = vpop.f32.mrb[0].mxu1 }
 0x14d   : > { %v707_v39 = vadd.f32 %v1836_v37, %v706_v38  ;;  %v1930_v40 = vpop.f32.mrb[1].mxu1 }
 0x14f   : > { %v796_v26 = vpop.f32.mrb[2].mxu0  ;;  %711 = vst.msk [vmem:[#allocation3] sm:$0xff] %vm555_vm1, %v707_v39 }
 0x150   : > { %v797_v27 = vadd.f32 %v1838_v22, %v796_v26  ;;  %v1941_v28 = vpop.f32.mrb[3].mxu0 }
 0x151   : > { %v801_v29 = vld [vmem:[#allocation2] sm:$0xff] }
 0x152   : > { %v800_v30 = vmul.f32 0.35355338, %v797_v27  ;;  %1139 = vrot.lane.b32.xlu1 %v801_v29, %s2305_s26  ;;  %967 = vrot.lane.b32.xlu0 %v801_v29, %s2306_s18 }
 0x153   : > { %1943 = vmatpush3.xpose.msk.msra.mxu0 %vm803_vm2, %v801_v29 }
 0x154   : > { %1952 = vmatprep.subr.mxu0 %v2304_v1 }
 0x156   : > { %1945 = vmatmul.mubr.msk.f32.vlgmr.msra.gmra.mrb[4].mxu0 %vm803_vm2, %v800_v30  ;;  %1137 = vrot.lane.b32.xlu1 %v800_v30, %s2305_s26  ;;  %v802_v44 = vld [vmem:[#allocation3] sm:$0xff] }
 0x157   : > { %965 = vrot.lane.b32.xlu0 %v800_v30, %s2306_s18  ;;  %1954 = vmatprep.mubr.msk.f32.mxu0 %vm2303_vm0, %v2304_v1 }
 0x158   : > { %1948 = vmatpush3.msra.mxu1 %v802_v44 }
 0x159   : > { %1957 = vmatprep.subr.mxu1 %v2304_v1 }
 0x15a   : > { %1308 = vrot.lane.b32.xlu1 %v800_v30, %s2307_s30 }
 0x15b   : > { %1310 = vrot.lane.b32.xlu0 %v801_v29, %s2307_s30 }
 0x1c4   : > { %v968_v31 = vpop.permute.xlu0 %967  ;;  %v1140_v32 = vpop.permute.xlu1 %1139 }
 0x1c5   : > { %1953 = vmatpush3.xpose.msk.msra.mxu0 %vm803_vm2, %v968_v31 }
 0x1c6   : > { %1962 = vmatprep.subr.mxu0 %v2304_v1 }
 0x1c8   : > { %v1138_v34 = vpop.permute.xlu1 %1137 }
 0x1c9   : > { %v966_v33 = vpop.permute.xlu0 %965 }
 0x1ca   : > { %1955 = vmatmul.mubr.msk.f32.vlgmr.msra.gmra.mrb[6].mxu0 %vm803_vm2, %v966_v33 }
 0x1cb   : > { %1963 = vmatpush3.xpose.msk.msra.mxu0 %vm803_vm2, %v1140_v32  ;;  %1964 = vmatprep.mubr.msk.f32.mxu0 %vm2303_vm0, %v2304_v1 }
 0x1cc   : > { %1972 = vmatprep.subr.mxu0 %v2304_v1  ;;  %v1309_v36 = vpop.permute.xlu1 %1308 }
 0x1cd   : > { %v1311_v35 = vpop.permute.xlu0 %1310 }
 0x1ce   : > { %1965 = vmatmul.mubr.msk.f32.vlgmr.msra.gmra.mrb[8].mxu0 %vm803_vm2, %v1138_v34 }
 0x1cf   : > { %1973 = vmatpush3.xpose.msk.msra.mxu0 %vm803_vm2, %v1311_v35  ;;  %1974 = vmatprep.mubr.msk.f32.mxu0 %vm2303_vm0, %v2304_v1 }
 0x1d0   : > { %2030 = vmatprep.subr.bf16.mxu0 %v2302_v0 }
 0x1d2   : > { %1975 = vmatmul.mubr.msk.f32.vlgmr.msra.gmra.mrb[10].mxu0 %vm803_vm2, %v1309_v36 }
 0x1d3   : > { %1990 = vmatprep.mubr.msk.f32.mxu0 %vm2303_vm0, %v2304_v1 }
 0x229   : > { %v876_v41 = vpop.f32.mrb[4].mxu0 }
 0x22a   : > { %v1946_v42 = vpop.f32.mrb[5].mxu0  ;;  %v880_v43 = vsel %vm803_vm2, %v876_v41, -inf }
 0x22b   : > { %881 = vmax.xlane.f32.xlu0 %v880_v43 }
 0x29d   : > { %v1039_v45 = vpop.f32.mrb[6].mxu0 }
 0x29e   : > { %v1956_v46 = vpop.f32.mrb[7].mxu0  ;;  %v1043_v47 = vsel %vm803_vm2, %v1039_v45, -inf }
 0x29f   : > { %1044 = vmax.xlane.f32.xlu1 %v1043_v47  ;;  %v1511_v46 = vld [vmem:[#allocation8] sm:$0xff]  ;;  %v1512_v47 = vld [vmem:[#allocation8 + $0x8] sm:$0xff] }
 0x2a1   : > { %v1211_v48 = vpop.f32.mrb[8].mxu0 }
 0x2a2   : > { %v1966_v49 = vpop.f32.mrb[9].mxu0  ;;  %v1215_v50 = vsel %vm803_vm2, %v1211_v48, -inf }
 0x2a3   : > { %1216 = vmax.xlane.f32.xlu0 %v1215_v50  ;;  %v1513_v49 = vld [vmem:[#allocation8 + $0x10] sm:$0xff]  ;;  %v1514_v50 = vld [vmem:[#allocation8 + $0x18] sm:$0xff] }
 0x2a5   : > { %v1382_v51 = vpop.f32.mrb[10].mxu0 }
 0x2a6   : > { %v1976_v52 = vpop.f32.mrb[11].mxu0  ;;  %v1386_v53 = vsel %vm803_vm2, %v1382_v51, -inf }
 0x2a7   : > { %1387 = vmax.xlane.f32.xlu0 %v1386_v53  ;;  %v1596_v52 = vld [vmem:[%s2802_s11] sm:$0xff]  ;;  %v1597_v53 = vld [vmem:[%s2802_s11 + $0x8] sm:$0xff] }
 0x2b0   : > { %1055 = vrot.lane.b32.xlu1 %v802_v44, %s2306_s18  ;;  %s2845_s18 = sld [smem:[#allocation23_spill]] }
 0x2b8   : > { %v882_v54 = vpop.xlane.xlu0 %881 }
 0x2b9   : > { %v883_v55 = vsub.f32 %v876_v41, %v882_v54  ;;  %v1598_v54 = vld [vmem:[%s2802_s11 + $0x10] sm:$0xff] }
 0x2bb   : > { %v884_v56 = vmul.f32 1.442695, %v883_v55  ;;  %v2037_v55 = vpack.c.bf16 %v1597_v53, %v1596_v52 }
 0x2bd   : > { %2132 = vpow2.f32 %v884_v56  ;;  %v1599_v56 = vld [vmem:[%s2802_s11 + $0x18] sm:$0xff] }
 0x2c7   : > { %v2133_v57 = vpop.eup %2132 }
 0x2c8   : > { %v886_v58 = vsel %vm803_vm2, %v2133_v57, 0.0 }
 0x2d4   : > { %887 = vadd.xlane.f32.xlu1 %v886_v58  ;;  %v1600_v58 = vld [vmem:[%s2802_s11 + $0x20] sm:$0xff] }
 0x32c   : > { %v1045_v59 = vpop.xlane.xlu1 %1044 }
 0x32d   : > { %v1046_v60 = vsub.f32 %v1039_v45, %v1045_v59  ;;  %v1601_v59 = vld [vmem:[%s2802_s11 + $0x28] sm:$0xff] }
 0x32f   : > { %v1047_v61 = vmul.f32 1.442695, %v1046_v60  ;;  %v2043_v60 = vpack.c.bf16 %v1601_v59, %v1600_v58 }
 0x330   : > { %v1217_v62 = vpop.xlane.xlu0 %1216  ;;  %v1056_v13 = vpop.permute.xlu1 %1055 }
 0x331   : > { %2134 = vpow2.f32 %v1047_v61  ;;  %v1218_v63 = vsub.f32 %v1211_v48, %v1217_v62  ;;  %v2031_v48 = vpack.c.bf16 %v1512_v47, %v1511_v46 }
 0x333   : > { %v1219_v2 = vmul.f32 1.442695, %v1218_v63  ;;  %2032 = vmatpush3.bf16.msra.mxu0 %v2031_v48 }
 0x334   : > { %v1388_v3 = vpop.xlane.xlu0 %1387  ;;  %2033 = vmatprep.subr.bf16.mxu0 %v2302_v0 }
 0x335   : > { %2136 = vpow2.f32 %v1219_v2  ;;  %v1389_v4 = vsub.f32 %v1382_v51, %v1388_v3  ;;  %v2034_v51 = vpack.c.bf16 %v1514_v50, %v1513_v49  ;;  %v1852_v3 = vld [vmem:[%s2798_s7] ss:$0 sm:$0xff] }
 0x337   : > { %v1390_v5 = vmul.f32 1.442695, %v1389_v4  ;;  %2035 = vmatpush3.bf16.msra.mxu0 %v2034_v51 }
 0x339   : > { %2138 = vpow2.f32 %v1390_v5  ;;  %v1853_v5 = vld [vmem:[%s2799_s8] ss:$0 sm:$0xff] }
 0x33b   : > { %v2135_v6 = vpop.eup %2134 }
 0x33c   : > { %v1049_v7 = vsel %vm803_vm2, %v2135_v6, 0.0 }
 0x33d   : > { %1050 = vadd.xlane.f32.xlu0 %v1049_v7 }
 0x33f   : > { %v2137_v8 = vpop.eup %2136 }
 0x340   : > { %v1221_v9 = vsel %vm803_vm2, %v2137_v8, 0.0 }
 0x341   : > { %1222 = vadd.xlane.f32.xlu1 %v1221_v9 }
 0x343   : > { %v2139_v11 = vpop.eup %2138 }
 0x344   : > { %v1392_v12 = vsel %vm803_vm2, %v2139_v11, 0.0 }
 0x345   : > { %1393 = vadd.xlane.f32.xlu0 %v1392_v12 }
 0x352   : > { %1397 = vrot.lane.b32.xlu1 %v802_v44, %s2307_s30  ;;  %s1861_s30 = sshll.u32 %s2843_s14, 7 }
 0x35b   : > { %1226 = vrot.lane.b32.xlu0 %v802_v44, %s2305_s26 }
 0x361   : > { %v888_v14 = vpop.xlane.xlu1 %887 }
 0x362   : > { %2140 = vrcp.f32 %v888_v14 }
 0x36c   : > { %v2141_v15 = vpop.eup %2140 }
 0x36d   : > { %v890_v16 = vmul.f32 %v2141_v15, %v2133_v57  ;;  %v2040_v57 = vpack.c.bf16 %v1599_v56, %v1598_v54 }
 0x36f   : > { %1950 = vmatmul.mubr.msk.f32.vlgmr.msra.gmra.mrb[2].mxu1 %vm803_vm2, %v890_v16 }
 0x370   : > { %1958 = vmatpush3.msra.mxu1 %v1056_v13  ;;  %1959 = vmatprep.mubr.msk.f32.mxu1 %vm2303_vm0, %v2304_v1 }
 0x371   : > { %1967 = vmatprep.subr.mxu1 %v2304_v1 }
 0x3ca   : > { %v1051_v17 = vpop.xlane.xlu0 %1050 }
 0x3cb   : > { %2142 = vrcp.f32 %v1051_v17 }
 0x3ce   : > { %v1223_v18 = vpop.xlane.xlu1 %1222 }
 0x3cf   : > { %2144 = vrcp.f32 %v1223_v18 }
 0x3d2   : > { %v1394_v19 = vpop.xlane.xlu0 %1393  ;;  %v1398_v25 = vpop.permute.xlu1 %1397 }
 0x3d3   : > { %2146 = vrcp.f32 %v1394_v19 }
 0x3d5   : > { %v2143_v20 = vpop.eup %2142 }
 0x3d6   : > { %v1053_v21 = vmul.f32 %v2143_v20, %v2135_v6  ;;  %v1227_v22 = vpop.permute.xlu0 %1226 }
 0x3d8   : > { %1960 = vmatmul.mubr.msk.f32.vlgmr.msra.gmra.mrb[4].mxu1 %vm803_vm2, %v1053_v21 }
 0x3d9   : > { %v2145_v23 = vpop.eup %2144  ;;  %1968 = vmatpush3.msra.mxu1 %v1227_v22  ;;  %1969 = vmatprep.mubr.msk.f32.mxu1 %vm2303_vm0, %v2304_v1 }
 0x3da   : > { %v1225_v24 = vmul.f32 %v2145_v23, %v2137_v8  ;;  %1977 = vmatprep.subr.mxu1 %v2304_v1  ;;  %v1603_v8 = vld [vmem:[%s2802_s11 + $0x38] sm:$0xff] }
 0x3dc   : > { %1970 = vmatmul.mubr.msk.f32.vlgmr.msra.gmra.mrb[6].mxu1 %vm803_vm2, %v1225_v24 }
 0x3dd   : > { %v2147_v26 = vpop.eup %2146  ;;  %1978 = vmatpush3.msra.mxu1 %v1398_v25  ;;  %1979 = vmatprep.mubr.msk.f32.mxu1 %vm2303_vm0, %v2304_v1 }
 0x3de   : > { %v1396_v27 = vmul.f32 %v2147_v26, %v2139_v11  ;;  %2036 = vmatprep.subr.bf16.mxu1 %v2302_v0  ;;  %v1854_v11 = vld [vmem:[%s2841_s12] ss:$0 sm:$0xff]  ;;  %s1732_s12 = sshll.u32 %s538_s24, 4  ;;  %s2743_s12 = int_to_ptr.vmem [resolvable:$true] %s1732_s12 }
 0x3df   : > { %s2210_s14 = scalar_lea.vmem %s2743_s12, 128  ;;  %p2217_p12 = scmp.lt.s32.totalorder %s2743_s12, %s2215_s9 }
 0x3e0   : > { %1980 = vmatmul.mubr.msk.f32.vlgmr.msra.gmra.mrb[8].mxu1 %vm803_vm2, %v1396_v27  ;;  %p2211_p4 = scmp.ne.s32.totalorder %s2743_s12, %s2210_s14 }
 0x3e1   : > { %2009 = vmatprep.mubr.msk.f32.mxu1 %vm2303_vm0, %v2304_v1  ;;  %2038 = vmatpush3.bf16.msra.mxu1 %v2037_v55 }
 0x3e2   : > { %2039 = vmatprep.subr.bf16.mxu1 %v2302_v0  ;;  %p2212_p6 = pnand %p2211_p4, %p2488_p10 }
 0x3e4   : > { %p2213_p8 = pneg %p2212_p6 }
 0x3e5   : > { %2041 = vmatpush3.bf16.msra.mxu1 %v2040_v57 }
 0x3e6   : > { %2042 = vmatprep.subr.bf16.mxu1 %v2302_v0 }
 0x3e9   : > { %2044 = vmatpush3.bf16.msra.mxu1 %v2043_v60 }
 0x3ea   : > { %2045 = vmatprep.subr.bf16.mxu1 %v2302_v0  ;;  %v1602_v0 = vld [vmem:[%s2802_s11 + $0x30] sm:$0xff] }
 0x3eb   : > { %v2046_v9 = vpack.c.bf16 %v1603_v8, %v1602_v0 }
 0x3ed   : > { %2047 = vmatpush3.bf16.msra.mxu1 %v2046_v9 }
 0x442   : > { %v960_v28 = vpop.f32.mrb[2].mxu1 }
 0x443   : > { %964 = vst.msk [vmem:[#allocation4] sm:$0xff] %vm803_vm2, %v960_v28  ;;  %v1951_v29 = vpop.f32.mrb[3].mxu1 }
 0x4ab   : > { %v1127_v30 = vpop.f32.mrb[4].mxu1 }
 0x4ac   : > { %1132 = vrot.lane.b32.xlu1 %v1127_v30, %s2308_s17  ;;  %v1961_v31 = vpop.f32.mrb[5].mxu1 }
 0x4ad   : > { %v1858_v31 = vld [vmem:[%s2844_s10] ss:$0 sm:$0xff]  ;;  %s2216_s10 = scalar_lea.vmem %s2215_s9, 256 }
 0x4ae   : > { %p2218_p11 = scmp.lt.s32.totalorder %s2216_s10, %s2210_s14 }
 0x4af   : > { %v1298_v32 = vpop.f32.mrb[6].mxu1 }
 0x4b0   : > { %1303 = vrot.lane.b32.xlu0 %v1298_v32, %s2309_s27  ;;  %v1971_v33 = vpop.f32.mrb[7].mxu1  ;;  %p2219_p0 = por %p2218_p11, %p2217_p12 }
 0x4b1   : > { %v1859_v33 = vld [vmem:[%s2845_s18] ss:$0 sm:$0xff] }
 0x4b2   : > { %p2220_p5 = pnand %p2219_p0, %p2213_p8 }
 0x4b3   : > { %v1469_v34 = vpop.f32.mrb[8].mxu1 }
 0x4b4   : > { %1474 = vrot.lane.b32.xlu1 %v1469_v34, %s2310_s16  ;;  %v1981_v35 = vpop.f32.mrb[9].mxu1  ;;  %s2842_s16 = sld [smem:[#allocation21_spill]] }
 0x4ba   : > { %v1856_v16 = vld [vmem:[%s2842_s16] ss:$0 sm:$0xff]  ;;  %s2846_s16 = sld [smem:[#allocation24_spill]] }
 0x4c0   : > { %s2741_s0 = scalar_lea.hbm %s2846_s16, %s1861_s30 }
 0x51e   : > { %v1133_v36 = vpop.permute.xlu1 %1132 }
 0x51f   : > { %1136 = vst.msk [vmem:[#allocation4] sm:$0xff] %vm1135_vm3, %v1133_v36 }
 0x522   : > { %v1304_v1 = vpop.permute.xlu0 %1303 }
 0x523   : > { %1307 = vst.msk [vmem:[#allocation4] sm:$0xff] %vm1306_vm4, %v1304_v1 }
 0x526   : > { %v1475_v37 = vpop.permute.xlu1 %1474 }
 0x527   : > { %1478 = vst.msk [vmem:[#allocation4] sm:$0xff] %vm1477_vm5, %v1475_v37 }
 0x52e   : > { %v1479_v38 = vld [vmem:[#allocation4] sm:$0xff] }
 0x52f   : > { %v1480_v39 = vadd.f32 %v1479_v38, %v2580_v10 }
 0x531   : > { %v1483_v40 = vsel %vm555_vm1, %v1480_v39, 0.0 }
 0x532   : > { %1484 = vadd.xlane.f32.xlu0 %v1483_v40 }
 0x5bf   : > { %v1485_v41 = vpop.xlane.xlu0 %1484 }
 0x5c0   : > { %v1487_v42 = vmul.f32 0.03125, %v1485_v41 }
 0x5c2   : > { %v1488_v43 = vsub.f32 %v1480_v39, %v1487_v42 }
 0x5c4   : > { %v1489_v44 = vmul.f32 %v1488_v43, %v1488_v43 }
 0x5c6   : > { %v1490_v45 = vsel %vm555_vm1, %v1489_v44, 0.0 }
 0x5c7   : > { %1491 = vadd.xlane.f32.xlu1 %v1490_v45 }
 0x654   : > { %v1492_v61 = vpop.xlane.xlu1 %1491 }
 0x655   : > { %v1493_v62 = vmul.f32 0.03125, %v1492_v61 }
 0x657   : > { %v1494_v63 = vadd.f32 1e-05, %v1493_v62 }
 0x659   : > { %2148 = vrsqrt.f32 %v1494_v63 }
 0x663   : > { %v2149_v2 = vpop.eup %2148 }
 0x664   : > { %v1496_v4 = vmul.f32 %v2149_v2, %v1488_v43 }
 0x666   : > { %v1503_v6 = vmul.f32 %v1852_v3, %v1496_v4 }
 0x668   : > { %v1510_v7 = vadd.f32 %v1853_v5, %v1503_v6 }
 0x66a   : > { %1991 = vmatmul.mubr.msk.f32.vlgmr.msra.gmra.mrb[12].mxu0 %vm555_vm1, %v1510_v7 }
 0x73d   : > { %v1591_v12 = vpop.f32.mrb[12].mxu0 }
 0x73e   : > { %v1592_v13 = vadd.f32 %v1854_v11, %v1591_v12  ;;  %v1992_v14 = vpop.f32.mrb[13].mxu0 }
 0x740   : > { %v1595_v15 = vmax.f32 %v1592_v13, 0.0 }
 0x742   : > { %2010 = vmatmul.mubr.msk.f32.vlgmr.msra.gmra.mrb[10].mxu1 %vm1611_vm6, %v1595_v15 }
 0x815   : > { %v1681_v17 = vpop.f32.mrb[10].mxu1 }
 0x816   : > { %v1682_v18 = vadd.f32 %v1856_v16, %v1681_v17  ;;  %v2011_v19 = vpop.f32.mrb[11].mxu1 }
 0x818   : > { %v1685_v20 = vadd.f32 %v1682_v18, %v1510_v7 }
 0x81a   : > { %v1688_v21 = vsel %vm555_vm1, %v1685_v20, 0.0 }
 0x81b   : > { %1689 = vadd.xlane.f32.xlu0 %v1688_v21 }
 0x8a8   : > { %v1690_v22 = vpop.xlane.xlu0 %1689 }
 0x8a9   : > { %v1691_v23 = vmul.f32 0.03125, %v1690_v22 }
 0x8ab   : > { %v1692_v24 = vsub.f32 %v1685_v20, %v1691_v23 }
 0x8ad   : > { %v1693_v25 = vmul.f32 %v1692_v24, %v1692_v24 }
 0x8af   : > { %v1694_v26 = vsel %vm555_vm1, %v1693_v25, 0.0 }
 0x8b0   : > { %1695 = vadd.xlane.f32.xlu0 %v1694_v26 }
 0x93d   : > { %v1696_v27 = vpop.xlane.xlu0 %1695 }
 0x93e   : > { %v1697_v28 = vmul.f32 0.03125, %v1696_v27 }
 0x940   : > { %v1698_v29 = vadd.f32 1e-05, %v1697_v28 }
 0x942   : > { %2150 = vrsqrt.f32 %v1698_v29 }
 0x94c   : > { %v2151_v30 = vpop.eup %2150 }
 0x94d   : > { %v1700_v32 = vmul.f32 %v2151_v30, %v1692_v24 }
 0x94f   : > { %v1707_v34 = vmul.f32 %v1858_v31, %v1700_v32 }
 0x951   : > { %v1714_v35 = vadd.f32 %v1859_v33, %v1707_v34 }
 0x953   : > { %v1715_v36 = vadd.f32 %v1714_v35, %v2580_v10 }
 0x955   : > { %1716 = vst.msk [vmem:[%s538_s24] sm:$0xff] %vm555_vm1, %v1715_v36 }
 0x956   : > { %2223 = shalt.err (!%p2220_p5)
}
 0x957   : > { %s2224_s25 = scalar_lea.hbm %s2741_s0, 128  ;;  %s2228_s18 = scalar_lea.hbm %s2846_s16, 256 }
 0x958   : > { %p2225_p9 = scmp.ne.s32.totalorder %s2741_s0, %s2224_s25  ;;  %p2229_p7 = scmp.lt.u32.totalorder %s2741_s0, %s2846_s16 }
 0x959   : > { %p2230_p3 = scmp.lt.u32.totalorder %s2228_s18, %s2224_s25  ;;  %p2232_p4 = scmp.lt.u32.totalorder %s2224_s25, %s2741_s0 }
 0x95a   : > { %p2226_p1 = pnand %p2225_p9, %p2488_p10 }
 0x95b   : > { %p2231_p13 = por %p2230_p3, %p2229_p7 }
 0x95c   : > { %p2227_p2 = pneg %p2226_p1 }
 0x95d   : > { %p2233_p6 = por %p2232_p4, %p2231_p13 }
 0x95f   : > { %p2234_p8 = pnand %p2233_p6, %p2227_p2 }
 0x961   : > { %2237 = shalt.err (!%p2234_p8)
}
 0x962   : > { %2054 = dma.vmem_to_hbm [thread:$0]  (%p2488_p10), %s2743_s12, 128, %s2741_s0, %s1718_s21  }
 0x963 PF: > { %s2847_s17 = sld [smem:[#allocation14_spill]]  ;;  %s2848_s27 = sld [smem:[#allocation16_spill]] }
 0x964   : > { %p2850_p11 = scmp.ge.s32.totalorder %s2296_s23, 2 }
 0x969   : > { %s1744_s14 = sand.u32 1, %s2847_s17   ;;  %p2849_p12 = scmp.ne.s32.totalorder %s2848_s27, 0 }
 0x96a   : > { %s1745_s15 = scalar_lea.sflag [#allocation7], %s1744_s14 }
 0x96b   : > { %p2065_p0 = pnand %p2850_p11, %p2849_p12 }
 0x96d   : > { %2271 = dma.done.wait (!%p2065_p0), %s1745_s15, 128  }
 0x96e   : > { %2273 = vsyncadd (!%p2065_p0), %s1745_s15, 4294967168  ;;  %s32_s23 = sadd.s32 1, %s2296_s23   ;;  %s2851_s29 = sld [smem:[#allocation17_spill]] }
 0x96f   : > { %p29_p5 = scmp.ge.s32.totalorder %s32_s23, 4   ;;  %s2852_s18 = smov %s2280_s19 }
 0x970   : > { %s2853_s19 = smov %s2284_s20  ;;  %s2854_s20 = smov %s2497_s13 }
 0x971   : > { %s2855_s21 = smov %s2292_s22  ;;  %31 = sbr.rel (!%p29_p5) target bundleno = 15 (0xf), region = 134 }
 0x974   : > { %s2856_s22 = smov %s2851_s29 }
 0x978   :  { %1750 = vsyncpa [#allocation6], 1 }
 0x979   :  { %1752 = vsyncpa [#allocation6 + $0x1], 1 }
 0x97a   :  { %1753 = vsyncpa [#allocation9], 1 }
 0x97b   :  { %1754 = vsyncpa [#allocation7], 1 }
 0x97c   :  { %1756 = vsyncpa [#allocation7 + $0x1], 1 }

</bundles_post_ra>
